<compile_context>
chip_gen: v5e
topology: v5e:2x2
jax: 0.10.0
libtpu: 0.0.40
codegen_flags: <defaults>
</compile_context>

<pallas_src>
import jax
import jax.numpy as jnp
from jax import lax
from jax.experimental import pallas as pl
from jax.experimental.pallas import tpu as pltpu


def _round_up(v, m):
    return ((v + m - 1) // m) * m


# ---------------------------------------------------------------------------
# Encoder: BatchNorm1d + GCN(in -> hidden) + leaky_relu + GCN(hidden -> D+1)
# + leaky_relu.  Gridless; feature transforms f32, aggregation bf16 on the MXU.
# ---------------------------------------------------------------------------
def gravity_encoder_kernel(x_ref, a_ref, g1_ref, be1_ref, w1_ref, b1_ref,
                           w2_ref, b2_ref, z_ref):
    eps = 1e-5
    slope = 0.1

    x = x_ref[...]                                           # [N, Cin] f32
    mean = jnp.mean(x, axis=0, keepdims=True)
    var = jnp.mean((x - mean) ** 2, axis=0, keepdims=True)   # biased variance
    xn = (x - mean) * lax.rsqrt(var + eps)
    xn = xn * g1_ref[...] + be1_ref[...]

    a = a_ref[...]                                           # [N, N] bf16 adjacency

    # X @ W stays f32 (tiny); A @ H runs bf16 x bf16 -> f32 on the MXU.
    h = jnp.dot(xn, w1_ref[...], preferred_element_type=jnp.float32)
    h = jnp.dot(a, h.astype(jnp.bfloat16),
                preferred_element_type=jnp.float32) + b1_ref[...]
    h = jnp.where(h >= 0.0, h, slope * h)

    z = jnp.dot(h, w2_ref[...], preferred_element_type=jnp.float32)
    z = jnp.dot(a, z.astype(jnp.bfloat16),
                preferred_element_type=jnp.float32) + b2_ref[...]
    z_ref[...] = jnp.where(z >= 0.0, z, slope * z)           # [N, D+1] f32


# ---------------------------------------------------------------------------
# Full-matrix gravity decoder: A[a, b] = sigmoid(mj[b] - ||z_a - z_b||).
# d2 comes straight out of one MXU contraction (norm terms folded in).
# ---------------------------------------------------------------------------
def gravity_decoder_kernel(za_ref, zb_ref, mj_ref, out_ref):
    # za[a,:] . zb[b,:] = ||z_a||^2 + ||z_b||^2 - 2 z_a.z_b = ||z_a - z_b||^2
    d2 = lax.dot_general(za_ref[...], zb_ref[...],
                         (((1,), (1,)), ((), ())),
                         preferred_element_type=jnp.float32)      # [tm, tn]
    dist = jnp.sqrt(jnp.maximum(d2, 0.0))
    logits = mj_ref[...] - dist                                   # mj per column b
    # sigmoid via a single EUP tanh (sqrt + tanh = 2 EUP ops, was 3).
    out_ref[...] = (0.5 + 0.5 * jnp.tanh(0.5 * logits)).astype(out_ref.dtype)


# ---------------------------------------------------------------------------
# Per-edge gravity decoder (no N^2 materialization).  Edges on the lane axis.
#   out[0, e] = sigmoid(mj[dst_e] - ||z[src_e] - z[dst_e]||)
# ---------------------------------------------------------------------------
def gravity_edge_decoder_kernel(zs_ref, zd_ref, mj_ref, out_ref):
    diff = zs_ref[...] - zd_ref[...]                      # [D, te] f32
    d2 = jnp.sum(diff * diff, axis=0, keepdims=True)      # [1, te]
    logits = mj_ref[...] - jnp.sqrt(d2)
    out_ref[...] = 0.5 + 0.5 * jnp.tanh(0.5 * logits)


# ---------------------------------------------------------------------------
# Wrappers
# ---------------------------------------------------------------------------
def _normalized_adjacency(edge_index, n):
    src, dst = edge_index[0], edge_index[1]
    # A_hat[i, j] = 1 if edge j->i exists, plus self loops.  .set() dedups
    # repeated edges (binary GCN adjacency); use .add() instead if weighted
    # multi-edges must accumulate.
    adj = jnp.zeros((n, n), jnp.float32).at[dst, src].set(1.0)
    adj = adj + jnp.eye(n, dtype=jnp.float32)
    deg = jnp.sum(adj, axis=1)
    dinv = jnp.where(deg > 0, lax.rsqrt(deg), 0.0)
    return adj * dinv[:, None] * dinv[None, :]


def gravity_encode(x, edge_index, params):
    n = x.shape[0]
    d1 = params["w2"].shape[1]                       # out_channels + 1
    a_norm = _normalized_adjacency(edge_index, n).astype(jnp.bfloat16)
    return pl.pallas_call(
        gravity_encoder_kernel,
        out_shape=jax.ShapeDtypeStruct((n, d1), jnp.float32),
        in_specs=[pl.BlockSpec(memory_space=pltpu.MemorySpace.VMEM)] * 8,
        out_specs=pl.BlockSpec(memory_space=pltpu.MemorySpace.VMEM),
        compiler_params=pltpu.CompilerParams(
            vmem_limit_bytes=32 * 1024 * 1024),
    )(x, a_norm,
      params["gamma1"], params["beta1"],
      params["w1"], params["b1"],
      params["w2"], params["b2"])


def gravity_decode_matrix(z):
    """Full [N_pad, N_pad] decoder, bf16 output.  A[a, b] = sigmoid(mj[b] - dist(a, b))."""
    n, d1 = z.shape
    d = d1 - 1
    zz = z[:, :d]
    mj = z[:, d]

    tm = 256
    n_pad = _round_up(n, tm)
    tn = next(t for t in (2048, 1024, 512, 256) if n_pad % t == 0)

    # bf16 MXU operands with the squared-norm terms folded into the contraction.
    # hi/lo split keeps the norms at ~f32 precision inside bf16 columns.
    zz_bf = zz.astype(jnp.bfloat16)
    zz_f32 = zz_bf.astype(jnp.float32)
    sq = jnp.sum(zz_f32 * zz_f32, axis=1, keepdims=True)       # [N, 1] f32
    hi = sq.astype(jnp.bfloat16)
    lo = (sq - hi.astype(jnp.float32)).astype(jnp.bfloat16)
    one = jnp.ones_like(hi)

    za = jnp.concatenate([-2.0 * zz_bf, hi, lo, one, one], axis=1)
    zb = jnp.concatenate([zz_bf, one, one, hi, lo], axis=1)
    k = d + 4
    k_pad = _round_up(k, 128)
    za = jnp.pad(za, ((0, n_pad - n), (0, k_pad - k)))
    zb = jnp.pad(zb, ((0, n_pad - n), (0, k_pad - k)))
    mj_row = jnp.pad(mj.reshape(1, n), ((0, 0), (0, n_pad - n)))

    grid = (n_pad // tm, n_pad // tn)
    # TODO(synk): if the output DMA is still exposed after tile enlargement,
    # add pipeline_mode=pl.Buffered(3) on out_specs.
    return pl.pallas_call(
        gravity_decoder_kernel,
        out_shape=jax.ShapeDtypeStruct((n_pad, n_pad), jnp.bfloat16),
        grid_spec=pltpu.PrefetchScalarGridSpec(
            num_scalar_prefetch=0,
            grid=grid,
            in_specs=[
                pl.BlockSpec((tm, k_pad), lambda i, j: (i, 0)),   # augmented rows a
                pl.BlockSpec((tn, k_pad), lambda i, j: (j, 0)),   # augmented cols b
                pl.BlockSpec((1, tn), lambda i, j: (0, j)),       # mj[b]
            ],
            out_specs=pl.BlockSpec((tm, tn), lambda i, j: (i, j)),
        ),
        compiler_params=pltpu.CompilerParams(
            dimension_semantics=("parallel", "parallel")),
    )(za, zb, mj_row)


def gravity_decode_edges(z, edge_index):
    """decode_typical_edge without materializing the N^2 matrix."""
    n, d1 = z.shape
    d = d1 - 1
    zz = z[:, :d]
    mj = z[:, d]

    src, dst = edge_index[0], edge_index[1]
    e = src.shape[0]

    zs = jnp.take(zz, src, axis=0)                  # [E, D]
    zd = jnp.take(zz, dst, axis=0)                  # [E, D]
    mj_d = jnp.take(mj, dst, axis=0)                # [E]

    e_lane = _round_up(e, 128)
    te = min(2048, e_lane)
    e_pad = _round_up(e_lane, te)

    zs_t = jnp.pad(zs, ((0, e_pad - e), (0, 0))).T              # [D, E_pad]
    zd_t = jnp.pad(zd, ((0, e_pad - e), (0, 0))).T              # [D, E_pad]
    mj_e = jnp.pad(mj_d, (0, e_pad - e)).reshape(1, e_pad)      # [1, E_pad]

    scores = pl.pallas_call(
        gravity_edge_decoder_kernel,
        out_shape=jax.ShapeDtypeStruct((1, e_pad), jnp.float32),
        grid_spec=pltpu.PrefetchScalarGridSpec(
            num_scalar_prefetch=0,
            grid=(e_pad // te,),
            in_specs=[
                pl.BlockSpec((d, te), lambda i: (0, i)),
                pl.BlockSpec((d, te), lambda i: (0, i)),
                pl.BlockSpec((1, te), lambda i: (0, i)),
            ],
            out_specs=pl.BlockSpec((1, te), lambda i: (0, i)),
        ),
        compiler_params=pltpu.CompilerParams(
            dimension_semantics=("parallel",)),
    )(zs_t, zd_t, mj_e)
    return scores[0, :e]


def gravity_ae_forward(x, edge_index, params, *, use_matrix_decoder=False):
    z = gravity_encode(x, edge_index, params)
    if use_matrix_decoder:
        a_mat = gravity_decode_matrix(z)
        # decode_typical_edge: res = A[0, src, dst]
        return a_mat[edge_index[0], edge_index[1]].astype(jnp.float32)
    return gravity_decode_edges(z, edge_index)


def reference_forward(x, edge_index, params):
    """Pure-JAX f32 reference mirroring the PyTorch forward semantics."""
    eps = 1e-5
    n = x.shape[0]
    mean = x.mean(0, keepdims=True)
    var = ((x - mean) ** 2).mean(0, keepdims=True)
    xn = (x - mean) / jnp.sqrt(var + eps) * params["gamma1"] + params["beta1"]

    a_norm = _normalized_adjacency(edge_index, n)

    def leaky(v):
        return jnp.where(v >= 0.0, v, 0.1 * v)

    h = leaky(a_norm @ (xn @ params["w1"]) + params["b1"])
    z = leaky(a_norm @ (h @ params["w2"]) + params["b2"])

    mj = z[:, -1]
    zz = z[:, :-1]
    diff = zz[None, :, :] - zz[:, None, :]
    dist = jnp.sqrt(jnp.sum(diff ** 2, axis=2))
    a_full = jax.nn.sigmoid(mj[None, :] - dist)     # A[i, j] = sig(mj[j] - dist)
    return a_full[edge_index[0], edge_index[1]]


if __name__ == "__main__":
    key = jax.random.PRNGKey(0)
    ks = jax.random.split(key, 8)

    N, Cin, H, Cout, E = 8, 4, 32, 16, 12
    D1 = Cout + 1

    x = jax.random.normal(ks[0], (N, Cin), jnp.float32)
    params = {
        "gamma1": 1.0 + 0.1 * jax.random.normal(ks[1], (1, Cin), jnp.float32),
        "beta1": 0.1 * jax.random.normal(ks[2], (1, Cin), jnp.float32),
        "w1": 0.3 * jax.random.normal(ks[3], (Cin, H), jnp.float32),
        "b1": 0.1 * jax.random.normal(ks[4], (1, H), jnp.float32),
        "w2": 0.3 * jax.random.normal(ks[5], (H, D1), jnp.float32),
        "b2": 0.1 * jax.random.normal(ks[6], (1, D1), jnp.float32),
    }
    edge_index = jnp.array(
        [[0, 1, 2, 3, 4, 5, 6, 7, 0, 2, 4, 6],
         [1, 2, 3, 4, 5, 6, 7, 0, 3, 5, 7, 1]], dtype=jnp.int32)

    out_edge = jax.block_until_ready(gravity_ae_forward(x, edge_index, params))
    out_mat = jax.block_until_ready(
        gravity_ae_forward(x, edge_index, params, use_matrix_decoder=True))
    assert out_edge.shape == (E,)
    assert out_mat.shape == (E,)

    ref = reference_forward(x, edge_index, params)
    # bf16 encoder aggregation -> slightly looser than pure-f32.
    assert jnp.allclose(out_edge, ref, atol=8e-3, rtol=1e-2), (out_edge, ref)
    # + bf16 decoder operands and bf16 output writeback on the matrix path.
    assert jnp.allclose(out_mat, ref, atol=1.5e-2, rtol=2e-2), (out_mat, ref)

    print("KERNEL_OK")
</pallas_src>

<mosaic_0001>
module attributes {stable_mosaic.version = 11 : i64} {
  func.func @gravity_encoder_kernel(%arg0: memref<8x4xf32, #tpu.memory_space<vmem>>, %arg1: memref<8x8xbf16, #tpu.memory_space<vmem>>, %arg2: memref<1x4xf32, #tpu.memory_space<vmem>>, %arg3: memref<1x4xf32, #tpu.memory_space<vmem>>, %arg4: memref<4x32xf32, #tpu.memory_space<vmem>>, %arg5: memref<1x32xf32, #tpu.memory_space<vmem>>, %arg6: memref<32x17xf32, #tpu.memory_space<vmem>>, %arg7: memref<1x17xf32, #tpu.memory_space<vmem>>, %arg8: memref<8x17xf32, #tpu.memory_space<vmem>>) attributes {dimension_semantics = [], scalar_prefetch = 0 : i64, scratch_operands = 0 : i64, tpu.core_type = #tpu.core_type<tc>} {
    %c0 = arith.constant 0 : index
    %c0_0 = arith.constant 0 : index
    %0 = vector.load %arg0[%c0, %c0_0] : memref<8x4xf32, #tpu.memory_space<vmem>>, vector<8x4xf32>
    %cst = arith.constant dense<0.000000e+00> : vector<4xf32>
    %1 = vector.multi_reduction <add>, %0, %cst [0] : vector<8x4xf32> to vector<4xf32>
    %2 = vector.shape_cast %1 : vector<4xf32> to vector<1x4xf32>
    %cst_1 = arith.constant 8.000000e+00 : f32
    %3 = vector.broadcast %cst_1 : f32 to vector<1x4xf32>
    %4 = arith.divf %2, %3 : vector<1x4xf32>
    %5 = vector.broadcast %4 : vector<1x4xf32> to vector<8x4xf32>
    %6 = arith.subf %0, %5 : vector<8x4xf32>
    %7 = arith.mulf %6, %6 : vector<8x4xf32>
    %cst_2 = arith.constant dense<0.000000e+00> : vector<4xf32>
    %8 = vector.multi_reduction <add>, %7, %cst_2 [0] : vector<8x4xf32> to vector<4xf32>
    %9 = vector.shape_cast %8 : vector<4xf32> to vector<1x4xf32>
    %cst_3 = arith.constant 8.000000e+00 : f32
    %10 = vector.broadcast %cst_3 : f32 to vector<1x4xf32>
    %11 = arith.divf %9, %10 : vector<1x4xf32>
    %12 = vector.broadcast %4 : vector<1x4xf32> to vector<8x4xf32>
    %13 = arith.subf %0, %12 : vector<8x4xf32>
    %cst_4 = arith.constant 9.99999974E-6 : f32
    %14 = vector.broadcast %cst_4 : f32 to vector<1x4xf32>
    %15 = arith.addf %11, %14 : vector<1x4xf32>
    %16 = math.rsqrt %15 : vector<1x4xf32>
    %17 = vector.broadcast %16 : vector<1x4xf32> to vector<8x4xf32>
    %18 = arith.mulf %13, %17 : vector<8x4xf32>
    %c0_5 = arith.constant 0 : index
    %c0_6 = arith.constant 0 : index
    %19 = vector.load %arg2[%c0_5, %c0_6] : memref<1x4xf32, #tpu.memory_space<vmem>>, vector<1x4xf32>
    %20 = vector.broadcast %19 : vector<1x4xf32> to vector<8x4xf32>
    %21 = arith.mulf %18, %20 : vector<8x4xf32>
    %c0_7 = arith.constant 0 : index
    %c0_8 = arith.constant 0 : index
    %22 = vector.load %arg3[%c0_7, %c0_8] : memref<1x4xf32, #tpu.memory_space<vmem>>, vector<1x4xf32>
    %23 = vector.broadcast %22 : vector<1x4xf32> to vector<8x4xf32>
    %24 = arith.addf %21, %23 : vector<8x4xf32>
    %c0_9 = arith.constant 0 : index
    %c0_10 = arith.constant 0 : index
    %25 = vector.load %arg1[%c0_9, %c0_10] : memref<8x8xbf16, #tpu.memory_space<vmem>>, vector<8x8xbf16>
    %c0_11 = arith.constant 0 : index
    %c0_12 = arith.constant 0 : index
    %26 = vector.load %arg4[%c0_11, %c0_12] : memref<4x32xf32, #tpu.memory_space<vmem>>, vector<4x32xf32>
    %cst_13 = arith.constant dense<0.000000e+00> : vector<8x32xf32>
    %27 = tpu.matmul %24, %26, %cst_13 {dimension_numbers = #tpu.dot_dimension_numbers<[1], [0], [0], [1], [0, 0, 1, 1], [], []>} : vector<8x4xf32>, vector<4x32xf32>, vector<8x32xf32> -> vector<8x32xf32>
    %28 = arith.truncf %27 : vector<8x32xf32> to vector<8x32xbf16>
    %cst_14 = arith.constant dense<0.000000e+00> : vector<8x32xf32>
    %29 = tpu.matmul %25, %28, %cst_14 {dimension_numbers = #tpu.dot_dimension_numbers<[1], [0], [0], [1], [0, 0, 1, 1], [], []>} : vector<8x8xbf16>, vector<8x32xbf16>, vector<8x32xf32> -> vector<8x32xf32>
    %c0_15 = arith.constant 0 : index
    %c0_16 = arith.constant 0 : index
    %30 = vector.load %arg5[%c0_15, %c0_16] : memref<1x32xf32, #tpu.memory_space<vmem>>, vector<1x32xf32>
    %31 = vector.broadcast %30 : vector<1x32xf32> to vector<8x32xf32>
    %32 = arith.addf %29, %31 : vector<8x32xf32>
    %cst_17 = arith.constant 0.000000e+00 : f32
    %33 = vector.broadcast %cst_17 : f32 to vector<8x32xf32>
    %34 = arith.cmpf oge, %32, %33 : vector<8x32xf32>
    %cst_18 = arith.constant 1.000000e-01 : f32
    %35 = vector.broadcast %cst_18 : f32 to vector<8x32xf32>
    %36 = arith.mulf %35, %32 : vector<8x32xf32>
    %37 = arith.select %34, %32, %36 : vector<8x32xi1>, vector<8x32xf32>
    %c0_19 = arith.constant 0 : index
    %c0_20 = arith.constant 0 : index
    %38 = vector.load %arg6[%c0_19, %c0_20] : memref<32x17xf32, #tpu.memory_space<vmem>>, vector<32x17xf32>
    %cst_21 = arith.constant dense<0.000000e+00> : vector<8x17xf32>
    %39 = tpu.matmul %37, %38, %cst_21 {dimension_numbers = #tpu.dot_dimension_numbers<[1], [0], [0], [1], [0, 0, 1, 1], [], []>} : vector<8x32xf32>, vector<32x17xf32>, vector<8x17xf32> -> vector<8x17xf32>
    %40 = arith.truncf %39 : vector<8x17xf32> to vector<8x17xbf16>
    %cst_22 = arith.constant dense<0.000000e+00> : vector<8x17xf32>
    %41 = tpu.matmul %25, %40, %cst_22 {dimension_numbers = #tpu.dot_dimension_numbers<[1], [0], [0], [1], [0, 0, 1, 1], [], []>} : vector<8x8xbf16>, vector<8x17xbf16>, vector<8x17xf32> -> vector<8x17xf32>
    %c0_23 = arith.constant 0 : index
    %c0_24 = arith.constant 0 : index
    %42 = vector.load %arg7[%c0_23, %c0_24] : memref<1x17xf32, #tpu.memory_space<vmem>>, vector<1x17xf32>
    %43 = vector.broadcast %42 : vector<1x17xf32> to vector<8x17xf32>
    %44 = arith.addf %41, %43 : vector<8x17xf32>
    %cst_25 = arith.constant 0.000000e+00 : f32
    %45 = vector.broadcast %cst_25 : f32 to vector<8x17xf32>
    %46 = arith.cmpf oge, %44, %45 : vector<8x17xf32>
    %cst_26 = arith.constant 1.000000e-01 : f32
    %47 = vector.broadcast %cst_26 : f32 to vector<8x17xf32>
    %48 = arith.mulf %47, %44 : vector<8x17xf32>
    %49 = arith.select %46, %44, %48 : vector<8x17xi1>, vector<8x17xf32>
    %c0_27 = arith.constant 0 : index
    %c0_28 = arith.constant 0 : index
    %50 = vector.load %arg8[%c0_27, %c0_28] : memref<8x17xf32, #tpu.memory_space<vmem>>, vector<8x17xf32>
    tpu.vector_store %arg8[%c0_27, %c0_28], %49 {strides = array<i32>} : memref<8x17xf32, #tpu.memory_space<vmem>>, vector<8x17xf32>,
    return
  }
}

</mosaic_0001>

<bundles_post_ra>
// kernel: tpu_custom_call.1
= control target key start
LH: loop header
LB: loop body
LE: loop exit
PB: predicated region body
PF: predicated region fallthrough
CT: control target
= control target key end

     0   :  { %vm85_vm0 = vcmask 1043456   ;;  %vm32_vm1 = vcmask 31744   ;;  %v248_v3 = vmov 8.0   ;;  %s339_s0 = inlined_call_operand.vmem [shape: f32[8,4], index: 0, kind: input, shape index: {}]   ;;  %s340_s1 = inlined_call_operand.vmem [shape: bf16[8,8], index: 1, kind: input, shape index: {}]   ;;  %s341_s2 = inlined_call_operand.vmem [shape: f32[1,4], index: 2, kind: input, shape index: {}]   ;;  %s342_s3 = inlined_call_operand.vmem [shape: f32[1,4], index: 3, kind: input, shape index: {}]   ;;  %s343_s4 = inlined_call_operand.vmem [shape: f32[4,32], index: 4, kind: input, shape index: {}]   ;;  %s344_s5 = inlined_call_operand.vmem [shape: f32[1,32], index: 5, kind: input, shape index: {}]   ;;  %s345_s6 = inlined_call_operand.vmem [shape: f32[32,17], index: 6, kind: input, shape index: {}]   ;;  %s346_s7 = inlined_call_operand.vmem [shape: f32[1,17], index: 7, kind: input, shape index: {}]   ;;  %s347_s8 = inlined_call_operand.hbm [shape: f32[8,17], index: 8, kind: output, shape index: {}]  }
   0x1   :  { %v81_v0 = vld [vmem:[%s343_s4] sm:$0xf]  ;;  %218 = vrcp.f32 %v248_v3 }
   0x2   :  { %v31_v1 = vld [vmem:[%s339_s0] sm:$0xff]  ;;  %207 = vmatpush.msk.msra.mxu0 %vm85_vm0, %v81_v0 }
   0x3   :  { %v33_v2 = vsel %vm32_vm1, %v31_v1, 0.0 }
   0x4   :  { %v34_v4 = vrot.slane %v33_v2, 4 }
   0x5   :  { %13 = vsyncpa [#allocation3], 0  ;;  %v214_v34 = vld [vmem:[%s341_s2] ss:$0 sm:$0xff]  ;;  %v140_v40 = vld [vmem:[%s345_s6 + $0x18] sm:$0xff]  ;;  %vm114_vm6 = vcmask 64512  }
   0x6   :  { %v35_v5 = vadd.f32 %v34_v4, %v33_v2  ;;  %v215_v37 = vld [vmem:[%s342_s3] ss:$0 sm:$0xff]  ;;  %157 = vmatpush.msra.mxu2 %v140_v40  ;;  %v139_v45 = vld [vmem:[%s345_s6 + $0x10] sm:$0xff]  ;;  %v138_v46 = vld [vmem:[%s345_s6 + $0x8] sm:$0xff]  ;;  %vm141_vm8 = vcmask 261120   ;;  %s198_s24 = sshll.u32 %s347_s8, 4  ;;  %s199_s24 = int_to_ptr.hbm [resolvable:$true] %s198_s24 }
   0x7   :  { %v219_v7 = vpop.eup %218  ;;  %v80_v44 = vld [vmem:[%s340_s1] sm:$0xf]  ;;  %vm189_vm10 = vcmask 138240  }
   0x8   :  { %v36_v6 = vrot.slane %v35_v5, 2  ;;  %v41_v9 = vmul.f32 8.0, %v219_v7  ;;  %vm45_vm2 = vweird.f32 %v219_v7  ;;  %158 = vmatpush.msra.mxu2 %v139_v45  ;;  %v137_v47 = vld [vmem:[%s345_s6] sm:$0xff] }
   0x9   :  { %v216_v48 = vld [vmem:[%s344_s5] ss:$0 sm:$0xff]  ;;  %s249_s5 = smov [#allocation2]  }
   0xa   :  { %v37_v8 = vadd.f32 %v36_v6, %v35_v5  ;;  %v42_v11 = vsub.f32 1.0, %v41_v9  ;;  %159 = vmatpush.msra.mxu2 %v138_v46  ;;  %v217_v57 = vld [vmem:[%s346_s7] ss:$0 sm:$0xff]  ;;  %s196_s21 = sshll.u32 %s249_s5, 4  ;;  %s197_s21 = int_to_ptr.vmem [resolvable:$true] %s196_s21 }
   0xc   :  { %v38_v10 = vrot.slane %v37_v8, 1  ;;  %v43_v12 = vmul.f32 %v219_v7, %v42_v11  ;;  %160 = vmatpush.msra.mxu2 %v137_v47 }
   0xe   :  { %v39_v13 = vadd.f32 %v38_v10, %v37_v8  ;;  %v44_v14 = vadd.f32 %v219_v7, %v43_v12 }
  0x10   :  { %v46_v15 = vsel %vm45_vm2, %v219_v7, %v44_v14 }
  0x11   :  { %v47_v16 = vmul.f32 %v46_v15, %v39_v13 }
  0x13   :  { %v48_v17 = vsub.f32 %v31_v1, %v47_v16 }
  0x15   :  { %v49_v18 = vmul.f32 %v48_v17, %v48_v17 }
  0x17   :  { %v50_v19 = vsel %vm32_vm1, %v49_v18, 0.0 }
  0x18   :  { %v51_v20 = vrot.slane %v50_v19, 4 }
  0x1a   :  { %v52_v21 = vadd.f32 %v51_v20, %v50_v19 }
  0x1c   :  { %v53_v22 = vrot.slane %v52_v21, 2 }
  0x1e   :  { %v54_v23 = vadd.f32 %v53_v22, %v52_v21 }
  0x20   :  { %v55_v24 = vrot.slane %v54_v23, 1 }
  0x22   :  { %v56_v25 = vadd.f32 %v55_v24, %v54_v23 }
  0x24   :  { %v57_v26 = vmul.f32 %v56_v25, %v46_v15 }
  0x26   :  { %v58_v27 = vadd.f32 1e-05, %v57_v26 }
  0x28   :  { %220 = vrsqrt.f32 %v58_v27  ;;  %vm65_vm3 = vweird.f32 %v58_v27 }
  0x2e   :  { %v221_v28 = vpop.eup %220 }
  0x2f   :  { %v60_v29 = vmul.f32 %v221_v28, %v58_v27  ;;  %vm66_vm4 = vweird.f32 %v221_v28 }
  0x30   :  { %vm67_vm5 = vmor %vm65_vm3, %vm66_vm4 }
  0x31   :  { %v61_v30 = vmul.f32 %v221_v28, %v60_v29 }
  0x33   :  { %v62_v31 = vmul.f32 0.5, %v61_v30 }
  0x35   :  { %v63_v32 = vsub.f32 1.5, %v62_v31 }
  0x37   :  { %v64_v33 = vmul.f32 %v221_v28, %v63_v32 }
  0x39   :  { %v68_v35 = vsel %vm67_vm5, %v221_v28, %v64_v33 }
  0x3a   :  { %v69_v36 = vmul.f32 %v68_v35, %v48_v17 }
  0x3c   :  { %v74_v38 = vmul.f32 %v214_v34, %v69_v36 }
  0x3e   :  { %v79_v39 = vadd.f32 %v215_v37, %v74_v38 }
  0x40   :  { %208 = vmatmul.msk.f32.vlgmr.msra.gmra.mxu0 %vm32_vm1, %v79_v39 }
  0xbd   :  { %v106_v41 = vpop.f32.mrf.mxu0 }
  0xbe   :  { %v109_v42 = vpack.c.bf16 %v106_v41, %v106_v41 }
  0xc0   :  { %v119_v43 = vsel %vm85_vm0, %v109_v42, 0 }
  0xc1   :  { %128 = vmatpush.bf16.msra.mxu1 %v119_v43 }
  0xc4   :  { %209 = vmatmul.msk.bf16.vlgmr.msra.gmra.mxu1 %vm114_vm6, %v80_v44 }
 0x141   :  { %v130_v49 = vpop.f32.mrf.mxu1 }
 0x142   :  { %v131_v50 = vadd.f32 %v216_v48, %v130_v49 }
 0x144   :  { %v135_v51 = vmul.f32 0.1, %v131_v50  ;;  %vm134_vm7 = vcmp.ge.f32.partialorder %v131_v50, 0.0 }
 0x146   :  { %v136_v52 = vsel %vm134_vm7, %v131_v50, %v135_v51 }
 0x147   :  { %210 = vmatmul.msk.f32.vlgmr.msra.gmra.mxu2 %vm141_vm8, %v136_v52 }
 0x149   :  { %v132_v53 = vpop.f32.mrf.mxu1 }
 0x1ca   :  { %v162_v54 = vpop.f32.mrf.mxu2 }
 0x1cb   :  { %v165_v55 = vpack.c.bf16 %v162_v54, %v162_v54 }
 0x1cd   :  { %v171_v56 = vsel %vm85_vm0, %v165_v55, 0 }
 0x1ce   :  { %180 = vmatpush.bf16.msra.mxu3 %v171_v56 }
 0x1d1   :  { %211 = vmatmul.msk.bf16.vlgmr.msra.gmra.mxu3 %vm114_vm6, %v80_v44 }
 0x254   :  { %v182_v58 = vpop.f32.mrf.mxu3 }
 0x255   :  { %v183_v59 = vadd.f32 %v217_v57, %v182_v58 }
 0x257   :  { %vm186_vm9 = vcmp.ge.f32.partialorder %v183_v59, 0.0  ;;  %v187_v60 = vmul.f32 0.1, %v183_v59 }
 0x259   :  { %v188_v61 = vsel %vm186_vm9, %v183_v59, %v187_v60 }
 0x25a   :  { %190 = vst.msk [vmem:[#allocation2] sm:$0xff] %vm189_vm10, %v188_v61 }
 0x25b   :  { %201 = dma.vmem_to_hbm [thread:$0]  %s197_s21, 128, %s199_s24, [#allocation3]  }
 0x25c   :  { %v184_v62 = vpop.f32.mrf.mxu3 }
 0x25d   :  { %246 = dma.done.wait [#allocation3], 128  }
 0x25e   :  { %247 = vsyncadd [#allocation3], 4294967168 }
 0x25f   :  { %206 = vsyncpa [#allocation3], 1 }

</bundles_post_ra>
